<compile_context>
chip_gen: v7x
topology: tpu7x:2x2x1
jax: 0.10.0
libtpu: 0.0.40
codegen_flags: <defaults>
</compile_context>

<pallas_src>
import functools

import jax
import jax.numpy as jnp
from jax.experimental import pallas as pl
from jax.experimental.pallas import tpu as pltpu

SUBLANE = 8  # f32 sublane count


def _round_up(n, m):
    return (n + m - 1) // m * m


def affine_kernel(x_ref, w_ref, b_ref, o_ref):
    # One fused GEMM + bias epilogue per batch tile.
    o_ref[...] = (
        jnp.dot(x_ref[...], w_ref[...], preferred_element_type=jnp.float32)
        + b_ref[...]
    )


def collapse_params(params):
    """Fold a chain of affine layers [(W,b), ...] into one (W_total, b_total).

    Exact for this module: there is no nonlinearity between layers.
    Weights are stored as (in_features, out_features): layer is x @ W + b.
    """
    w_tot, b_tot = params[0]
    for w, b in params[1:]:
        b_tot = b_tot @ w + b
        w_tot = w_tot @ w
    return w_tot, b_tot


@functools.partial(jax.jit, static_argnames=("block_b",))
def mlp_forward(x, params, block_b=512):
    """x: (B, input_dim) f32. params: list of (W, b) with W as (in, out)."""
    B, in_dim = x.shape
    w_tot, b_tot = collapse_params(params)  # tiny (<=32x32) matmuls, negligible
    out_dim = w_tot.shape[1]

    # Batch tile: multiple of 8 sublanes, capped at block_b rows per step.
    tb = min(block_b, _round_up(B, SUBLANE))
    bp = _round_up(B, tb)

    # Pad the batch dim only when needed (static check -> no op for aligned B).
    x_in = x if bp == B else jnp.pad(x, ((0, bp - B), (0, 0)))

    out = pl.pallas_call(
        affine_kernel,
        out_shape=jax.ShapeDtypeStruct((bp, out_dim), jnp.float32),
        grid=(bp // tb,),
        in_specs=[
            pl.BlockSpec((tb, in_dim), lambda i: (i, 0)),       # batch-tiled x
            pl.BlockSpec((in_dim, out_dim), lambda i: (0, 0)),  # weights resident
            pl.BlockSpec((1, out_dim), lambda i: (0, 0)),       # bias resident
        ],
        out_specs=pl.BlockSpec((tb, out_dim), lambda i: (i, 0)),
        compiler_params=pltpu.CompilerParams(
            dimension_semantics=("parallel",),  # batch tiles independent
        ),
    )(x_in, w_tot, b_tot)

    return out if bp == B else out[:B]


def init_params(key, input_dim, output_dim):
    """Deterministic init mimicking nn.Linear's uniform(-1/sqrt(fan_in), +)."""
    dims = [input_dim, 32, 16, 8, 8, output_dim]
    params = []
    for i in range(5):
        fan_in, fan_out = dims[i], dims[i + 1]
        key, kw, kb = jax.random.split(key, 3)
        bound = 1.0 / jnp.sqrt(jnp.float32(fan_in))
        w = jax.random.uniform(kw, (fan_in, fan_out), jnp.float32, -bound, bound)
        b = jax.random.uniform(kb, (1, fan_out), jnp.float32, -bound, bound)
        params.append((w, b))
    return params


def reference_forward(x, params):
    # Layer-by-layer reference, matching the PyTorch forward exactly.
    h = x
    for w, b in params:
        h = h @ w + b
    return h


if __name__ == "__main__":
    key = jax.random.PRNGKey(0)
    input_dim = 9    # ddarung features after dropping 'count'
    output_dim = 1
    batch = 16

    key, kx = jax.random.split(key)
    x = jax.random.normal(kx, (batch, input_dim), jnp.float32)
    params = init_params(key, input_dim, output_dim)

    out = mlp_forward(x, params)
    out = jax.block_until_ready(out)

    ref = reference_forward(x, params)
    assert out.shape == (batch, output_dim)
    assert jnp.allclose(out, ref, atol=1e-4, rtol=1e-4), "mismatch vs reference"

    print("KERNEL_OK")
</pallas_src>

<mosaic_0001>
module attributes {stable_mosaic.version = 11 : i64} {
  func.func @affine_kernel(%arg0: i32, %arg1: memref<16x9xf32, #tpu.memory_space<vmem>>, %arg2: memref<9x1xf32, #tpu.memory_space<vmem>>, %arg3: memref<1x1xf32, #tpu.memory_space<vmem>>, %arg4: memref<16x1xf32, #tpu.memory_space<vmem>>) attributes {dimension_semantics = [#tpu.dimension_semantics<parallel>], iteration_bounds = array<i64: 1>, scalar_prefetch = 0 : i64, scratch_operands = 0 : i64, tpu.core_type = #tpu.core_type<tc>, window_params = [{transform_indices = @transform_0, window_bounds = array<i64: 16, 9>}, {pipeline_mode = #tpu.pipeline_mode<synchronous>, transform_indices = @transform_1, window_bounds = array<i64: 9, 1>}, {pipeline_mode = #tpu.pipeline_mode<synchronous>, transform_indices = @transform_2, window_bounds = array<i64: 1, 1>}, {transform_indices = @transform_3, window_bounds = array<i64: 16, 1>}]} {
    %c0 = arith.constant 0 : index
    %c0_0 = arith.constant 0 : index
    %0 = vector.load %arg1[%c0, %c0_0] : memref<16x9xf32, #tpu.memory_space<vmem>>, vector<16x9xf32>
    %c0_1 = arith.constant 0 : index
    %c0_2 = arith.constant 0 : index
    %1 = vector.load %arg2[%c0_1, %c0_2] : memref<9x1xf32, #tpu.memory_space<vmem>>, vector<9x1xf32>
    %cst = arith.constant dense<0.000000e+00> : vector<16x1xf32>
    %2 = tpu.matmul %0, %1, %cst {dimension_numbers = #tpu.dot_dimension_numbers<[1], [0], [0], [1], [0, 0, 1, 1], [], []>} : vector<16x9xf32>, vector<9x1xf32>, vector<16x1xf32> -> vector<16x1xf32>
    %c0_3 = arith.constant 0 : index
    %c0_4 = arith.constant 0 : index
    %3 = vector.load %arg3[%c0_3, %c0_4] : memref<1x1xf32, #tpu.memory_space<vmem>>, vector<1x1xf32>
    %4 = vector.broadcast %3 : vector<1x1xf32> to vector<16x1xf32>
    %5 = arith.addf %2, %4 : vector<16x1xf32>
    %c0_5 = arith.constant 0 : index
    %c0_6 = arith.constant 0 : index
    %6 = vector.load %arg4[%c0_5, %c0_6] : memref<16x1xf32, #tpu.memory_space<vmem>>, vector<16x1xf32>
    tpu.vector_store %arg4[%c0_5, %c0_6], %5 {strides = array<i32>} : memref<16x1xf32, #tpu.memory_space<vmem>>, vector<16x1xf32>,
    return
  }
  func.func @transform_0(%arg0: i32) -> (i32, i32) {
    %c0_i32 = arith.constant 0 : i32
    %c0_i32_0 = arith.constant 0 : i32
    return %arg0, %c0_i32 : i32, i32
  }
  func.func @transform_1(%arg0: i32) -> (i32, i32) {
    %c0_i32 = arith.constant 0 : i32
    %c0_i32_0 = arith.constant 0 : i32
    %c0_i32_1 = arith.constant 0 : i32
    return %c0_i32, %c0_i32_0 : i32, i32
  }
  func.func @transform_2(%arg0: i32) -> (i32, i32) {
    %c0_i32 = arith.constant 0 : i32
    %c0_i32_0 = arith.constant 0 : i32
    %c0_i32_1 = arith.constant 0 : i32
    return %c0_i32, %c0_i32_0 : i32, i32
  }
  func.func @transform_3(%arg0: i32) -> (i32, i32) {
    %c0_i32 = arith.constant 0 : i32
    %c0_i32_0 = arith.constant 0 : i32
    return %arg0, %c0_i32 : i32, i32
  }
}

</mosaic_0001>

<bundles_post_ra>
// kernel: mlp_forward.1
= control target key start
LH: loop header
LB: loop body
LE: loop exit
PB: predicated region body
PF: predicated region fallthrough
CT: control target
= control target key end

     0   :  { %vm34_vm0 = vcmask 1040384   ;;  %vm27_vm1 = vcmask 72704   ;;  %vm142_vm2 = vmmov 1   ;;  %vm113_vm4 = vcmask 7168   ;;  %s184_s1 = inlined_call_operand.vmem [shape: f32[9,1], index: 1, kind: input, shape index: {}]   ;;  %s185_s0 = inlined_call_operand.vmem [shape: f32[16,9], index: 0, kind: input, shape index: {}]   ;;  %s186_s2 = inlined_call_operand.<no memory space> [shape: f32[1,1], index: 2, kind: input, shape index: {}]   ;;  %s187_s3 = inlined_call_operand.vmem [shape: f32[16,1], index: 3, kind: output, shape index: {}]  }
   0x1   :  { %v18_v0 = vld [vmem:[%s184_s1] sm:$0xff]  ;;  %v19_v1 = vld [vmem:[%s184_s1 + $0x8] sm:$0x1]  ;;  %vm136_vm3 = vmpackc.low %vm34_vm0, %vm142_vm2  ;;  %v8_v2 = vstv %s186_s2 }
   0x2   :  { %v135_v3 = vpack.c.bf16 %v19_v1, %v18_v0  ;;  %v16_v4 = vld [vmem:[%s185_s0] sm:$0xff]  ;;  %9 = vst [vmem:[#allocation2] sm:$0x1] %v8_v2  ;;  %v17_v5 = vld [vmem:[%s185_s0 + $0x8] sm:$0xff] }
   0x3   :  { %132 = vmatprep.mubr.msk.f32.mxu0 %vm27_vm1, %v16_v4 }
   0x4   :  { %137 = vmatprep.subr.msk.bf16.mxu0 %vm136_vm3, %v135_v3 }
   0x5   :  { %140 = vmatpush3.bf16.msk.msra.mxu0 %vm136_vm3, %v135_v3 }
   0x8   :  { %133 = vmatmul.mubr.msk.f32.vlgmr.msra.gmra.mrb[0].mxu0 %vm27_vm1, %v17_v5 }
   0x9   :  { %v120_v6 = vld [vmem:[#allocation2] ss:$0 sm:$0xff] }
  0xdb   :  { %v134_v7 = vpop.f32.mrb[0].mxu0 }
  0xdc   :  { %v110_v8 = vadd.f32 %v134_v7, %v120_v6  ;;  %v104_v9 = vpop.f32.mrb[1].mxu0 }
  0xdd   :  { %v105_v10 = vadd.f32 %v120_v6, %v104_v9 }
  0xde   :  { %115 = vst.msk [vmem:[%s187_s3 + $0x8] sm:$0xff] %vm113_vm4, %v110_v8 }
  0xdf   :  { %114 = vst.msk [vmem:[%s187_s3] sm:$0xff] %vm113_vm4, %v105_v10 }

</bundles_post_ra>
